<compile_context>
chip_gen: v7x
topology: tpu7x:2x2x1
jax: 0.10.0
libtpu: 0.0.40
codegen_flags: <defaults>
</compile_context>

<pallas_src>
import functools

import jax
import jax.numpy as jnp
import numpy as np
from jax import lax
from jax.experimental import pallas as pl
from jax.experimental.pallas import tpu as pltpu


def _lstm_dqn_kernel(x_ref, hc0_ref, w_ref, q_ref, hcout_ref, *, B, T, S, H, A):
    f32 = jnp.float32
    brow = S + 2 * H  # bias row index in the packed slab

    # ---- Unpack the single weight slab (static, tile-aligned slices; loaded once) ----
    w1 = w_ref[0:S, 0:H]                          # (S, H)    layer1 weight^T
    wih = w_ref[S:S + H, 0:4 * H]                 # (H, 4H)   lane-aligned
    whh = w_ref[S:S + H, 4 * H:8 * H]             # (H, 4H)   lane-aligned (recurrence RHS)
    w2 = w_ref[S + H:S + 2 * H, 0:A]              # (H, A)    layer2 weight^T
    bg = w_ref[brow:brow + 1, 0:4 * H]            # (1, 4H)   b_ih + b_hh
    b1 = w_ref[brow:brow + 1, 4 * H:5 * H]        # (1, H)
    b2 = w_ref[brow:brow + 1, 5 * H:5 * H + A]    # (1, A)

    # ---- Prologue: all time-invariant projections as two batched matmuls (M = T*B) ----
    x2d = x_ref[...]                                                       # (T*B, S) time-major
    pre = jnp.maximum(jnp.dot(x2d, w1, preferred_element_type=f32) + b1, 0.0)
    xg = jnp.dot(pre, wih, preferred_element_type=f32) + bg                # (T*B, 4H)

    # ---- Serial LSTM recurrence (static unroll; only h @ W_hh on the critical path) ----
    h_t = hc0_ref[0:B, :].astype(f32)        # (B, H)
    c_t = hc0_ref[B:2 * B, :].astype(f32)    # (B, H)
    hs = []
    for t in range(T):
        gates = xg[t * B:(t + 1) * B, :] + jnp.dot(h_t, whh, preferred_element_type=f32)
        # Activate the full (B, 4H) vreg once per nonlinearity, then slice lanes.
        sig = jax.nn.sigmoid(gates)
        tah = jnp.tanh(gates)
        i_g = sig[:, 0 * H:1 * H]
        f_g = sig[:, 1 * H:2 * H]
        g_g = tah[:, 2 * H:3 * H]
        o_g = sig[:, 3 * H:4 * H]
        c_t = f_g * c_t + i_g * g_g
        h_t = o_g * jnp.tanh(c_t)
        hs.append(h_t)                       # stays in vregs (no VMEM round-trip)

    # ---- Epilogue: ONE batched output projection + single stores ----
    h_all = jnp.concatenate(hs, axis=0)                                    # (T*B, H) time-major
    q = jnp.maximum(jnp.dot(h_all, w2, preferred_element_type=f32) + b2, 0.0)
    q_ref[...] = q.astype(q_ref.dtype)                                     # (T*B, A), once
    hcout_ref[...] = jnp.concatenate([h_t, c_t], axis=0).astype(hcout_ref.dtype)  # (2B, H), once


def make_lstm_dqn_forward(params):
    """Pack params once (hoisted off the per-call path) and return a jitted forward fn."""
    H, S = params["w1"].shape
    A = params["w2"].shape[0]

    # One (S + 2H + 1, 8H) f32 slab: W1^T | [W_ih^T  W_hh^T] | W2^T | [bg  b1  b2].
    cols = 8 * H
    rows = S + 2 * H + 1
    slab = jnp.zeros((rows, cols), jnp.float32)
    slab = slab.at[0:S, 0:H].set(params["w1"].T)
    slab = slab.at[S:S + H, 0:4 * H].set(params["w_ih"].T)
    slab = slab.at[S:S + H, 4 * H:8 * H].set(params["w_hh"].T)
    slab = slab.at[S + H:S + 2 * H, 0:A].set(params["w2"].T)
    bias = jnp.concatenate([params["b_ih"] + params["b_hh"], params["b1"], params["b2"]])
    slab = slab.at[S + 2 * H, 0:5 * H + A].set(bias)
    slab = jax.device_put(slab)  # materialized once; captured below as a jit constant

    vmem = pl.BlockSpec(memory_space=pltpu.MemorySpace.VMEM)

    @jax.jit
    def forward(x, h, c):
        """x: (B, T, S); h, c: (1, B, H) -> (q: (B, T, A), new_h: (1,B,H), new_c: (1,B,H))."""
        B, T, S_x = x.shape
        assert S_x == S
        # Time-major flatten so each per-step gate slice in the kernel is a contiguous
        # 2-sublane extract (wrapper-side transpose touches ~1 KiB).
        x_tm = jnp.transpose(x.astype(jnp.float32), (1, 0, 2)).reshape(T * B, S)
        hc0 = jnp.concatenate([h[0], c[0]], axis=0).astype(jnp.float32)   # (2B, H)

        kernel = functools.partial(_lstm_dqn_kernel, B=B, T=T, S=S, H=H, A=A)
        q_tm, hc_out = pl.pallas_call(
            kernel,
            out_shape=(
                jax.ShapeDtypeStruct((T * B, A), jnp.float32),
                jax.ShapeDtypeStruct((2 * B, H), jnp.float32),
            ),
            in_specs=[vmem, vmem, vmem],
            out_specs=(vmem, vmem),
        )(x_tm, hc0, slab)

        q = jnp.transpose(q_tm.reshape(T, B, A), (1, 0, 2))                # back to batch-first
        return q, hc_out[:B][None], hc_out[B:][None]

    return forward


def lstm_dqn_reference(x, h, c, params):
    """Pure-JAX reference matching torch semantics (for verification)."""
    H = params["w1"].shape[0]
    pre = jax.nn.relu(jnp.einsum("bts,hs->bth", x, params["w1"]) + params["b1"])

    def step(carry, x_t):
        h_t, c_t = carry
        gates = (x_t @ params["w_ih"].T + params["b_ih"]
                 + h_t @ params["w_hh"].T + params["b_hh"])
        i = jax.nn.sigmoid(gates[:, 0 * H:1 * H])
        f = jax.nn.sigmoid(gates[:, 1 * H:2 * H])
        g = jnp.tanh(gates[:, 2 * H:3 * H])
        o = jax.nn.sigmoid(gates[:, 3 * H:4 * H])
        c_new = f * c_t + i * g
        h_new = o * jnp.tanh(c_new)
        return (h_new, c_new), h_new

    (h_fin, c_fin), hs = lax.scan(step, (h[0], c[0]), jnp.transpose(pre, (1, 0, 2)))
    hs = jnp.transpose(hs, (1, 0, 2))  # (B, T, H)
    q = jax.nn.relu(jnp.einsum("bth,ah->bta", hs, params["w2"]) + params["b2"])
    return q, h_fin[None], c_fin[None]


def make_params(key, state_dim, hidden, actions):
    ks = jax.random.split(key, 8)
    s = 0.1
    return {
        "w1": s * jax.random.normal(ks[0], (hidden, state_dim), jnp.float32),
        "b1": s * jax.random.normal(ks[1], (hidden,), jnp.float32),
        "w_ih": s * jax.random.normal(ks[2], (4 * hidden, hidden), jnp.float32),
        "w_hh": s * jax.random.normal(ks[3], (4 * hidden, hidden), jnp.float32),
        "b_ih": s * jax.random.normal(ks[4], (4 * hidden,), jnp.float32),
        "b_hh": s * jax.random.normal(ks[5], (4 * hidden,), jnp.float32),
        "w2": s * jax.random.normal(ks[6], (actions, hidden), jnp.float32),
        "b2": s * jax.random.normal(ks[7], (actions,), jnp.float32),
    }


if __name__ == "__main__":
    B, T, STATE_DIM, HIDDEN, ACTIONS = 2, 8, 16, 32, 4

    key = jax.random.PRNGKey(0)
    k_x, k_h, k_c, k_p = jax.random.split(key, 4)

    x = jax.random.normal(k_x, (B, T, STATE_DIM), jnp.float32)
    h = jax.random.normal(k_h, (1, B, HIDDEN), jnp.float32)
    c = jax.random.normal(k_c, (1, B, HIDDEN), jnp.float32)
    params = make_params(k_p, STATE_DIM, HIDDEN, ACTIONS)

    forward = make_lstm_dqn_forward(params)   # packing hoisted out of the per-call path
    q, new_h, new_c = forward(x, h, c)
    jax.block_until_ready((q, new_h, new_c))

    q_ref, h_ref, c_ref = lstm_dqn_reference(x, h, c, params)
    np.testing.assert_allclose(np.asarray(q), np.asarray(q_ref), rtol=1e-4, atol=1e-5)
    np.testing.assert_allclose(np.asarray(new_h), np.asarray(h_ref), rtol=1e-4, atol=1e-5)
    np.testing.assert_allclose(np.asarray(new_c), np.asarray(c_ref), rtol=1e-4, atol=1e-5)

    print("KERNEL_OK")
</pallas_src>

<mosaic_0001>
module attributes {stable_mosaic.version = 11 : i64} {
  func.func @_lstm_dqn_kernel(%arg0: memref<16x16xf32, #tpu.memory_space<vmem>>, %arg1: memref<4x32xf32, #tpu.memory_space<vmem>>, %arg2: memref<81x256xf32, #tpu.memory_space<vmem>>, %arg3: memref<16x4xf32, #tpu.memory_space<vmem>>, %arg4: memref<4x32xf32, #tpu.memory_space<vmem>>) attributes {dimension_semantics = [], scalar_prefetch = 0 : i64, scratch_operands = 0 : i64, tpu.core_type = #tpu.core_type<tc>} {
    %c0 = arith.constant 0 : index
    %c0_0 = arith.constant 0 : index
    %0 = vector.load %arg2[%c0, %c0_0] : memref<81x256xf32, #tpu.memory_space<vmem>>, vector<16x32xf32>
    %c16 = arith.constant 16 : index
    %c0_1 = arith.constant 0 : index
    %1 = vector.load %arg2[%c16, %c0_1] : memref<81x256xf32, #tpu.memory_space<vmem>>, vector<32x128xf32>
    %c16_2 = arith.constant 16 : index
    %c128 = arith.constant 128 : index
    %2 = vector.load %arg2[%c16_2, %c128] : memref<81x256xf32, #tpu.memory_space<vmem>>, vector<32x128xf32>
    %c48 = arith.constant 48 : index
    %c0_3 = arith.constant 0 : index
    %3 = vector.load %arg2[%c48, %c0_3] : memref<81x256xf32, #tpu.memory_space<vmem>>, vector<32x4xf32>
    %c80 = arith.constant 80 : index
    %c0_4 = arith.constant 0 : index
    %4 = vector.load %arg2[%c80, %c0_4] : memref<81x256xf32, #tpu.memory_space<vmem>>, vector<1x128xf32>
    %c80_5 = arith.constant 80 : index
    %c128_6 = arith.constant 128 : index
    %5 = vector.load %arg2[%c80_5, %c128_6] : memref<81x256xf32, #tpu.memory_space<vmem>>, vector<1x32xf32>
    %c80_7 = arith.constant 80 : index
    %c160 = arith.constant 160 : index
    %6 = vector.load %arg2[%c80_7, %c160] : memref<81x256xf32, #tpu.memory_space<vmem>>, vector<1x4xf32>
    %c0_8 = arith.constant 0 : index
    %c0_9 = arith.constant 0 : index
    %7 = vector.load %arg0[%c0_8, %c0_9] : memref<16x16xf32, #tpu.memory_space<vmem>>, vector<16x16xf32>
    %cst = arith.constant dense<0.000000e+00> : vector<16x32xf32>
    %8 = tpu.matmul %7, %0, %cst {dimension_numbers = #tpu.dot_dimension_numbers<[1], [0], [0], [1], [0, 0, 1, 1], [], []>} : vector<16x16xf32>, vector<16x32xf32>, vector<16x32xf32> -> vector<16x32xf32>
    %9 = vector.broadcast %5 : vector<1x32xf32> to vector<16x32xf32>
    %10 = arith.addf %8, %9 : vector<16x32xf32>
    %cst_10 = arith.constant 0.000000e+00 : f32
    %11 = vector.broadcast %cst_10 : f32 to vector<16x32xf32>
    %12 = arith.maximumf %10, %11 : vector<16x32xf32>
    %cst_11 = arith.constant dense<0.000000e+00> : vector<16x128xf32>
    %13 = tpu.matmul %12, %1, %cst_11 {dimension_numbers = #tpu.dot_dimension_numbers<[1], [0], [0], [1], [0, 0, 1, 1], [], []>} : vector<16x32xf32>, vector<32x128xf32>, vector<16x128xf32> -> vector<16x128xf32>
    %14 = vector.broadcast %4 : vector<1x128xf32> to vector<16x128xf32>
    %15 = arith.addf %13, %14 : vector<16x128xf32>
    %c0_12 = arith.constant 0 : index
    %c0_13 = arith.constant 0 : index
    %16 = vector.load %arg1[%c0_12, %c0_13] : memref<4x32xf32, #tpu.memory_space<vmem>>, vector<2x32xf32>
    %c2 = arith.constant 2 : index
    %c0_14 = arith.constant 0 : index
    %17 = vector.load %arg1[%c2, %c0_14] : memref<4x32xf32, #tpu.memory_space<vmem>>, vector<2x32xf32>
    %18 = vector.extract_strided_slice %15 {offsets = [0, 0], sizes = [2, 128], strides = [1, 1]} : vector<16x128xf32> to vector<2x128xf32>
    %cst_15 = arith.constant dense<0.000000e+00> : vector<2x128xf32>
    %19 = tpu.matmul %16, %2, %cst_15 {dimension_numbers = #tpu.dot_dimension_numbers<[1], [0], [0], [1], [0, 0, 1, 1], [], []>} : vector<2x32xf32>, vector<32x128xf32>, vector<2x128xf32> -> vector<2x128xf32>
    %20 = arith.addf %18, %19 : vector<2x128xf32>
    %21 = arith.negf %20 : vector<2x128xf32>
    %22 = math.exp %21 : vector<2x128xf32>
    %cst_16 = arith.constant 1.000000e+00 : f32
    %23 = vector.broadcast %cst_16 : f32 to vector<2x128xf32>
    %24 = arith.addf %23, %22 : vector<2x128xf32>
    %25 = arith.divf %23, %24 : vector<2x128xf32>
    %26 = math.tanh %20 : vector<2x128xf32>
    %27 = vector.extract_strided_slice %25 {offsets = [0, 0], sizes = [2, 32], strides = [1, 1]} : vector<2x128xf32> to vector<2x32xf32>
    %28 = vector.extract_strided_slice %25 {offsets = [0, 32], sizes = [2, 32], strides = [1, 1]} : vector<2x128xf32> to vector<2x32xf32>
    %29 = vector.extract_strided_slice %26 {offsets = [0, 64], sizes = [2, 32], strides = [1, 1]} : vector<2x128xf32> to vector<2x32xf32>
    %30 = vector.extract_strided_slice %25 {offsets = [0, 96], sizes = [2, 32], strides = [1, 1]} : vector<2x128xf32> to vector<2x32xf32>
    %31 = arith.mulf %28, %17 : vector<2x32xf32>
    %32 = arith.mulf %27, %29 : vector<2x32xf32>
    %33 = arith.addf %31, %32 : vector<2x32xf32>
    %34 = math.tanh %33 : vector<2x32xf32>
    %35 = arith.mulf %30, %34 : vector<2x32xf32>
    %36 = vector.extract_strided_slice %15 {offsets = [2, 0], sizes = [2, 128], strides = [1, 1]} : vector<16x128xf32> to vector<2x128xf32>
    %cst_17 = arith.constant dense<0.000000e+00> : vector<2x128xf32>
    %37 = tpu.matmul %35, %2, %cst_17 {dimension_numbers = #tpu.dot_dimension_numbers<[1], [0], [0], [1], [0, 0, 1, 1], [], []>} : vector<2x32xf32>, vector<32x128xf32>, vector<2x128xf32> -> vector<2x128xf32>
    %38 = arith.addf %36, %37 : vector<2x128xf32>
    %39 = arith.negf %38 : vector<2x128xf32>
    %40 = math.exp %39 : vector<2x128xf32>
    %cst_18 = arith.constant 1.000000e+00 : f32
    %41 = vector.broadcast %cst_18 : f32 to vector<2x128xf32>
    %42 = arith.addf %41, %40 : vector<2x128xf32>
    %43 = arith.divf %41, %42 : vector<2x128xf32>
    %44 = math.tanh %38 : vector<2x128xf32>
    %45 = vector.extract_strided_slice %43 {offsets = [0, 0], sizes = [2, 32], strides = [1, 1]} : vector<2x128xf32> to vector<2x32xf32>
    %46 = vector.extract_strided_slice %43 {offsets = [0, 32], sizes = [2, 32], strides = [1, 1]} : vector<2x128xf32> to vector<2x32xf32>
    %47 = vector.extract_strided_slice %44 {offsets = [0, 64], sizes = [2, 32], strides = [1, 1]} : vector<2x128xf32> to vector<2x32xf32>
    %48 = vector.extract_strided_slice %43 {offsets = [0, 96], sizes = [2, 32], strides = [1, 1]} : vector<2x128xf32> to vector<2x32xf32>
    %49 = arith.mulf %46, %33 : vector<2x32xf32>
    %50 = arith.mulf %45, %47 : vector<2x32xf32>
    %51 = arith.addf %49, %50 : vector<2x32xf32>
    %52 = math.tanh %51 : vector<2x32xf32>
    %53 = arith.mulf %48, %52 : vector<2x32xf32>
    %54 = vector.extract_strided_slice %15 {offsets = [4, 0], sizes = [2, 128], strides = [1, 1]} : vector<16x128xf32> to vector<2x128xf32>
    %cst_19 = arith.constant dense<0.000000e+00> : vector<2x128xf32>
    %55 = tpu.matmul %53, %2, %cst_19 {dimension_numbers = #tpu.dot_dimension_numbers<[1], [0], [0], [1], [0, 0, 1, 1], [], []>} : vector<2x32xf32>, vector<32x128xf32>, vector<2x128xf32> -> vector<2x128xf32>
    %56 = arith.addf %54, %55 : vector<2x128xf32>
    %57 = arith.negf %56 : vector<2x128xf32>
    %58 = math.exp %57 : vector<2x128xf32>
    %cst_20 = arith.constant 1.000000e+00 : f32
    %59 = vector.broadcast %cst_20 : f32 to vector<2x128xf32>
    %60 = arith.addf %59, %58 : vector<2x128xf32>
    %61 = arith.divf %59, %60 : vector<2x128xf32>
    %62 = math.tanh %56 : vector<2x128xf32>
    %63 = vector.extract_strided_slice %61 {offsets = [0, 0], sizes = [2, 32], strides = [1, 1]} : vector<2x128xf32> to vector<2x32xf32>
    %64 = vector.extract_strided_slice %61 {offsets = [0, 32], sizes = [2, 32], strides = [1, 1]} : vector<2x128xf32> to vector<2x32xf32>
    %65 = vector.extract_strided_slice %62 {offsets = [0, 64], sizes = [2, 32], strides = [1, 1]} : vector<2x128xf32> to vector<2x32xf32>
    %66 = vector.extract_strided_slice %61 {offsets = [0, 96], sizes = [2, 32], strides = [1, 1]} : vector<2x128xf32> to vector<2x32xf32>
    %67 = arith.mulf %64, %51 : vector<2x32xf32>
    %68 = arith.mulf %63, %65 : vector<2x32xf32>
    %69 = arith.addf %67, %68 : vector<2x32xf32>
    %70 = math.tanh %69 : vector<2x32xf32>
    %71 = arith.mulf %66, %70 : vector<2x32xf32>
    %72 = vector.extract_strided_slice %15 {offsets = [6, 0], sizes = [2, 128], strides = [1, 1]} : vector<16x128xf32> to vector<2x128xf32>
    %cst_21 = arith.constant dense<0.000000e+00> : vector<2x128xf32>
    %73 = tpu.matmul %71, %2, %cst_21 {dimension_numbers = #tpu.dot_dimension_numbers<[1], [0], [0], [1], [0, 0, 1, 1], [], []>} : vector<2x32xf32>, vector<32x128xf32>, vector<2x128xf32> -> vector<2x128xf32>
    %74 = arith.addf %72, %73 : vector<2x128xf32>
    %75 = arith.negf %74 : vector<2x128xf32>
    %76 = math.exp %75 : vector<2x128xf32>
    %cst_22 = arith.constant 1.000000e+00 : f32
    %77 = vector.broadcast %cst_22 : f32 to vector<2x128xf32>
    %78 = arith.addf %77, %76 : vector<2x128xf32>
    %79 = arith.divf %77, %78 : vector<2x128xf32>
    %80 = math.tanh %74 : vector<2x128xf32>
    %81 = vector.extract_strided_slice %79 {offsets = [0, 0], sizes = [2, 32], strides = [1, 1]} : vector<2x128xf32> to vector<2x32xf32>
    %82 = vector.extract_strided_slice %79 {offsets = [0, 32], sizes = [2, 32], strides = [1, 1]} : vector<2x128xf32> to vector<2x32xf32>
    %83 = vector.extract_strided_slice %80 {offsets = [0, 64], sizes = [2, 32], strides = [1, 1]} : vector<2x128xf32> to vector<2x32xf32>
    %84 = vector.extract_strided_slice %79 {offsets = [0, 96], sizes = [2, 32], strides = [1, 1]} : vector<2x128xf32> to vector<2x32xf32>
    %85 = arith.mulf %82, %69 : vector<2x32xf32>
    %86 = arith.mulf %81, %83 : vector<2x32xf32>
    %87 = arith.addf %85, %86 : vector<2x32xf32>
    %88 = math.tanh %87 : vector<2x32xf32>
    %89 = arith.mulf %84, %88 : vector<2x32xf32>
    %90 = vector.extract_strided_slice %15 {offsets = [8, 0], sizes = [2, 128], strides = [1, 1]} : vector<16x128xf32> to vector<2x128xf32>
    %cst_23 = arith.constant dense<0.000000e+00> : vector<2x128xf32>
    %91 = tpu.matmul %89, %2, %cst_23 {dimension_numbers = #tpu.dot_dimension_numbers<[1], [0], [0], [1], [0, 0, 1, 1], [], []>} : vector<2x32xf32>, vector<32x128xf32>, vector<2x128xf32> -> vector<2x128xf32>
    %92 = arith.addf %90, %91 : vector<2x128xf32>
    %93 = arith.negf %92 : vector<2x128xf32>
    %94 = math.exp %93 : vector<2x128xf32>
    %cst_24 = arith.constant 1.000000e+00 : f32
    %95 = vector.broadcast %cst_24 : f32 to vector<2x128xf32>
    %96 = arith.addf %95, %94 : vector<2x128xf32>
    %97 = arith.divf %95, %96 : vector<2x128xf32>
    %98 = math.tanh %92 : vector<2x128xf32>
    %99 = vector.extract_strided_slice %97 {offsets = [0, 0], sizes = [2, 32], strides = [1, 1]} : vector<2x128xf32> to vector<2x32xf32>
    %100 = vector.extract_strided_slice %97 {offsets = [0, 32], sizes = [2, 32], strides = [1, 1]} : vector<2x128xf32> to vector<2x32xf32>
    %101 = vector.extract_strided_slice %98 {offsets = [0, 64], sizes = [2, 32], strides = [1, 1]} : vector<2x128xf32> to vector<2x32xf32>
    %102 = vector.extract_strided_slice %97 {offsets = [0, 96], sizes = [2, 32], strides = [1, 1]} : vector<2x128xf32> to vector<2x32xf32>
    %103 = arith.mulf %100, %87 : vector<2x32xf32>
    %104 = arith.mulf %99, %101 : vector<2x32xf32>
    %105 = arith.addf %103, %104 : vector<2x32xf32>
    %106 = math.tanh %105 : vector<2x32xf32>
    %107 = arith.mulf %102, %106 : vector<2x32xf32>
    %108 = vector.extract_strided_slice %15 {offsets = [10, 0], sizes = [2, 128], strides = [1, 1]} : vector<16x128xf32> to vector<2x128xf32>
    %cst_25 = arith.constant dense<0.000000e+00> : vector<2x128xf32>
    %109 = tpu.matmul %107, %2, %cst_25 {dimension_numbers = #tpu.dot_dimension_numbers<[1], [0], [0], [1], [0, 0, 1, 1], [], []>} : vector<2x32xf32>, vector<32x128xf32>, vector<2x128xf32> -> vector<2x128xf32>
    %110 = arith.addf %108, %109 : vector<2x128xf32>
    %111 = arith.negf %110 : vector<2x128xf32>
    %112 = math.exp %111 : vector<2x128xf32>
    %cst_26 = arith.constant 1.000000e+00 : f32
    %113 = vector.broadcast %cst_26 : f32 to vector<2x128xf32>
    %114 = arith.addf %113, %112 : vector<2x128xf32>
    %115 = arith.divf %113, %114 : vector<2x128xf32>
    %116 = math.tanh %110 : vector<2x128xf32>
    %117 = vector.extract_strided_slice %115 {offsets = [0, 0], sizes = [2, 32], strides = [1, 1]} : vector<2x128xf32> to vector<2x32xf32>
    %118 = vector.extract_strided_slice %115 {offsets = [0, 32], sizes = [2, 32], strides = [1, 1]} : vector<2x128xf32> to vector<2x32xf32>
    %119 = vector.extract_strided_slice %116 {offsets = [0, 64], sizes = [2, 32], strides = [1, 1]} : vector<2x128xf32> to vector<2x32xf32>
    %120 = vector.extract_strided_slice %115 {offsets = [0, 96], sizes = [2, 32], strides = [1, 1]} : vector<2x128xf32> to vector<2x32xf32>
    %121 = arith.mulf %118, %105 : vector<2x32xf32>
    %122 = arith.mulf %117, %119 : vector<2x32xf32>
    %123 = arith.addf %121, %122 : vector<2x32xf32>
    %124 = math.tanh %123 : vector<2x32xf32>
    %125 = arith.mulf %120, %124 : vector<2x32xf32>
    %126 = vector.extract_strided_slice %15 {offsets = [12, 0], sizes = [2, 128], strides = [1, 1]} : vector<16x128xf32> to vector<2x128xf32>
    %cst_27 = arith.constant dense<0.000000e+00> : vector<2x128xf32>
    %127 = tpu.matmul %125, %2, %cst_27 {dimension_numbers = #tpu.dot_dimension_numbers<[1], [0], [0], [1], [0, 0, 1, 1], [], []>} : vector<2x32xf32>, vector<32x128xf32>, vector<2x128xf32> -> vector<2x128xf32>
    %128 = arith.addf %126, %127 : vector<2x128xf32>
    %129 = arith.negf %128 : vector<2x128xf32>
    %130 = math.exp %129 : vector<2x128xf32>
    %cst_28 = arith.constant 1.000000e+00 : f32
    %131 = vector.broadcast %cst_28 : f32 to vector<2x128xf32>
    %132 = arith.addf %131, %130 : vector<2x128xf32>
    %133 = arith.divf %131, %132 : vector<2x128xf32>
    %134 = math.tanh %128 : vector<2x128xf32>
    %135 = vector.extract_strided_slice %133 {offsets = [0, 0], sizes = [2, 32], strides = [1, 1]} : vector<2x128xf32> to vector<2x32xf32>
    %136 = vector.extract_strided_slice %133 {offsets = [0, 32], sizes = [2, 32], strides = [1, 1]} : vector<2x128xf32> to vector<2x32xf32>
    %137 = vector.extract_strided_slice %134 {offsets = [0, 64], sizes = [2, 32], strides = [1, 1]} : vector<2x128xf32> to vector<2x32xf32>
    %138 = vector.extract_strided_slice %133 {offsets = [0, 96], sizes = [2, 32], strides = [1, 1]} : vector<2x128xf32> to vector<2x32xf32>
    %139 = arith.mulf %136, %123 : vector<2x32xf32>
    %140 = arith.mulf %135, %137 : vector<2x32xf32>
    %141 = arith.addf %139, %140 : vector<2x32xf32>
    %142 = math.tanh %141 : vector<2x32xf32>
    %143 = arith.mulf %138, %142 : vector<2x32xf32>
    %144 = vector.extract_strided_slice %15 {offsets = [14, 0], sizes = [2, 128], strides = [1, 1]} : vector<16x128xf32> to vector<2x128xf32>
    %cst_29 = arith.constant dense<0.000000e+00> : vector<2x128xf32>
    %145 = tpu.matmul %143, %2, %cst_29 {dimension_numbers = #tpu.dot_dimension_numbers<[1], [0], [0], [1], [0, 0, 1, 1], [], []>} : vector<2x32xf32>, vector<32x128xf32>, vector<2x128xf32> -> vector<2x128xf32>
    %146 = arith.addf %144, %145 : vector<2x128xf32>
    %147 = arith.negf %146 : vector<2x128xf32>
    %148 = math.exp %147 : vector<2x128xf32>
    %cst_30 = arith.constant 1.000000e+00 : f32
    %149 = vector.broadcast %cst_30 : f32 to vector<2x128xf32>
    %150 = arith.addf %149, %148 : vector<2x128xf32>
    %151 = arith.divf %149, %150 : vector<2x128xf32>
    %152 = math.tanh %146 : vector<2x128xf32>
    %153 = vector.extract_strided_slice %151 {offsets = [0, 0], sizes = [2, 32], strides = [1, 1]} : vector<2x128xf32> to vector<2x32xf32>
    %154 = vector.extract_strided_slice %151 {offsets = [0, 32], sizes = [2, 32], strides = [1, 1]} : vector<2x128xf32> to vector<2x32xf32>
    %155 = vector.extract_strided_slice %152 {offsets = [0, 64], sizes = [2, 32], strides = [1, 1]} : vector<2x128xf32> to vector<2x32xf32>
    %156 = vector.extract_strided_slice %151 {offsets = [0, 96], sizes = [2, 32], strides = [1, 1]} : vector<2x128xf32> to vector<2x32xf32>
    %157 = arith.mulf %154, %141 : vector<2x32xf32>
    %158 = arith.mulf %153, %155 : vector<2x32xf32>
    %159 = arith.addf %157, %158 : vector<2x32xf32>
    %160 = math.tanh %159 : vector<2x32xf32>
    %161 = arith.mulf %156, %160 : vector<2x32xf32>
    %162 = tpu.concatenate %35, %53, %71, %89, %107, %125, %143, %161 in 0 : vector<2x32xf32>, vector<2x32xf32>, vector<2x32xf32>, vector<2x32xf32>, vector<2x32xf32>, vector<2x32xf32>, vector<2x32xf32>, vector<2x32xf32> -> vector<16x32xf32>
    %cst_31 = arith.constant dense<0.000000e+00> : vector<16x4xf32>
    %163 = tpu.matmul %162, %3, %cst_31 {dimension_numbers = #tpu.dot_dimension_numbers<[1], [0], [0], [1], [0, 0, 1, 1], [], []>} : vector<16x32xf32>, vector<32x4xf32>, vector<16x4xf32> -> vector<16x4xf32>
    %164 = vector.broadcast %6 : vector<1x4xf32> to vector<16x4xf32>
    %165 = arith.addf %163, %164 : vector<16x4xf32>
    %cst_32 = arith.constant 0.000000e+00 : f32
    %166 = vector.broadcast %cst_32 : f32 to vector<16x4xf32>
    %167 = arith.maximumf %165, %166 : vector<16x4xf32>
    %c0_33 = arith.constant 0 : index
    %c0_34 = arith.constant 0 : index
    %168 = vector.load %arg3[%c0_33, %c0_34] : memref<16x4xf32, #tpu.memory_space<vmem>>, vector<16x4xf32>
    tpu.vector_store %arg3[%c0_33, %c0_34], %167 {strides = array<i32>} : memref<16x4xf32, #tpu.memory_space<vmem>>, vector<16x4xf32>,
    %169 = tpu.concatenate %161, %159 in 0 : vector<2x32xf32>, vector<2x32xf32> -> vector<4x32xf32>
    %c0_35 = arith.constant 0 : index
    %c0_36 = arith.constant 0 : index
    %170 = vector.load %arg4[%c0_35, %c0_36] : memref<4x32xf32, #tpu.memory_space<vmem>>, vector<4x32xf32>
    tpu.vector_store %arg4[%c0_35, %c0_36], %169 {strides = array<i32>} : memref<4x32xf32, #tpu.memory_space<vmem>>, vector<4x32xf32>,
    return
  }
}

</mosaic_0001>

<bundles_post_ra>
// kernel: forward.1
= control target key start
LH: loop header
LB: loop body
LE: loop exit
PB: predicated region body
PF: predicated region fallthrough
CT: control target
= control target key end

     0   :  { %10 = vsyncpa [#allocation3], 0  ;;  %s1549_s15 = smov [#allocation2]   ;;  %s1751_s0 = inlined_call_operand.vmem [shape: f32[16,16], index: 0, kind: input, shape index: {}]   ;;  %s1752_s1 = inlined_call_operand.vmem [shape: f32[4,32], index: 1, kind: input, shape index: {}]   ;;  %s1753_s2 = inlined_call_operand.hbm [shape: f32[81,256], index: 2, kind: input, shape index: {}]   ;;  %s1754_s3 = inlined_call_operand.vmem [shape: f32[16,4], index: 3, kind: output, shape index: {0}]   ;;  %s1755_s4 = inlined_call_operand.vmem [shape: f32[4,32], index: 4, kind: output, shape index: {1}]  }
   0x1   :  { %s20_s16 = sshll.u32 %s1549_s15, 4  ;;  %s1525_s19 = scalar_lea.hbm %s1753_s2, 2816  ;;  %s21_s16 = int_to_ptr.vmem [resolvable:$true] %s20_s16 }
   0x2   :  { %p1526_p0 = scmp.ne.s32.totalorder %s1753_s2, %s1525_s19  ;;  %p1529_p1 = scmp.lt.u32.totalorder %s1525_s19, %s1753_s2 }
   0x4   :  { %p1531_p2 = pnand %p1529_p1, %p1526_p0 }
   0x6   :  { %1534 = shalt.err (!%p1531_p2)
}
   0x7   :  { %s1535_s24 = scalar_lea.vmem %s21_s16, 2816  ;;  %p1540_p4 = scmp.lt.s32.totalorder %s21_s16, %s21_s16 }
   0x8   :  { %p1536_p3 = scmp.ne.s32.totalorder %s21_s16, %s1535_s24  ;;  %p1541_p5 = scmp.lt.s32.totalorder %s1535_s24, %s1535_s24 }
   0xa   :  { %p1542_p6 = por %p1541_p5, %p1540_p4 }
   0xc   :  { %p1543_p7 = pnand %p1542_p6, %p1536_p3 }
   0xe   :  { %1546 = shalt.err (!%p1543_p7)
}
   0xf   :  { %s1550_s25 = smov 256   ;;  %s1551_s26 = smov 16  }
  0x10   :  { %26 = dma.hbm_to_vmem [thread:$0]  %s1753_s2, 2816, %s21_s16, [#allocation3], %s1550_s25, %s1550_s25, %s1551_s26  }
  0x11   :  { %1547 = dma.done.wait [#allocation3], 2816  }
  0x12   :  { %1548 = vsyncadd [#allocation3], 4294964480  ;;  %vm48_vm0 = vcmask 130048   ;;  %v30_v0 = vld [vmem:[#allocation2] sm:$0xff]  ;;  %v31_v1 = vld [vmem:[#allocation2 + $0x10] sm:$0xff]  ;;  %v1552_v13 = vmov 0.0|0.0  }
  0x13   :  { %v46_v2 = vld [vmem:[%s1751_s0] sm:$0xff]  ;;  %v1384_v3 = vpack.c.bf16 %v31_v1, %v30_v0  ;;  %v33_v5 = vld [vmem:[#allocation2 + $0x30] sm:$0xff]  ;;  %v47_v7 = vld [vmem:[%s1751_s0 + $0x8] sm:$0xff]  ;;  %vm132_vm1 = vcmask 261120   ;;  %vm1553_vm2 = vmmov 0   ;;  %v1554_v19 = vmov 0.0  }
  0x14   :  { %1271 = vmatprep.mubr.msk.f32.mxu0 %vm48_vm0, %v46_v2  ;;  %v32_v4 = vld [vmem:[#allocation2 + $0x20] sm:$0xff]  ;;  %v36_v8 = vld [vmem:[#allocation2 + $0x28] sm:$0xff]  ;;  %v37_v9 = vld [vmem:[#allocation2 + $0x38] sm:$0xff]  ;;  %s1555_s7 = smov 64   ;;  %s1556_s10 = smov 32   ;;  %vm1062_vm3 = vcmask 1041408  }
  0x15   :  { %v1388_v6 = vpack.c.bf16 %v33_v5, %v32_v4  ;;  %1385 = vmatprep.subr.bf16.mxu0 %v1384_v3  ;;  %v1601_v10 = vpack.c.bf16 %v37_v9, %v36_v8  ;;  %v34_v11 = vld [vmem:[#allocation2 + $0x40] sm:$0xff]  ;;  %v35_v12 = vld [vmem:[#allocation2 + $0x50] sm:$0xff]  ;;  %v38_v15 = vld [vmem:[#allocation2 + $0x48] sm:$0xff]  ;;  %vm1064_vm4 = vcmask 1043456   ;;  %vm1066_vm5 = vcmask 1045504  }
  0x16   :  { %1387 = vmatpush3.bf16.msra.mxu0 %v1384_v3  ;;  %v1392_v14 = vpack.c.bf16 %v35_v12, %v34_v11  ;;  %v39_v16 = vld [vmem:[#allocation2 + $0x58] sm:$0xff]  ;;  %v214_v18 = vld [vmem:[%s1752_s1] sm:$0x3]  ;;  %v1623_v20 = vld [vmem:[#allocation2 + $0xa8] ss:$0 sm:$0xff]  ;;  %vm1178_vm6 = vcmask 257024  }
  0x17   :  { %1389 = vmatprep.subr.bf16.mxu1 %v1388_v6  ;;  %1396 = vmatprep.subr.bf16.mxu0 %v1552_v13  ;;  %v1606_v17 = vpack.c.bf16 %v39_v16, %v38_v15  ;;  %v44_v29 = vld [vmem:[#allocation2 + $0xa0] ss:$0 sm:$0xff]  ;;  %v215_v36 = vld [vmem:[%s1752_s1 + $0x2] sm:$0x3]  ;;  %s1557_s1 = smov 96   ;;  %vm1162_vm7 = vcmask 31744  }
  0x18   :  { %1391 = vmatpush3.bf16.msra.mxu1 %v1388_v6 }
  0x19   :  { %1272 = vmatmul.mubr.msk.f32.vlgmr.msra.gmra.mrb[0].mxu0 %vm48_vm0, %v47_v7  ;;  %1393 = vmatprep.subr.bf16.mxu1 %v1392_v14 }
  0x1a   :  { %1398 = vmatpush3.bf16.msra.mxu0 %v1601_v10  ;;  %1293 = vmatprep.mubr.msk.f32.mxu0 %vm1553_vm2, %v1554_v19 }
  0x1b   :  { %1399 = vmatprep.subr.bf16.mxu0 %v1552_v13 }
  0x1c   :  { %1395 = vmatpush3.bf16.msra.mxu1 %v1392_v14 }
  0x1d   :  { %1402 = vmatprep.subr.bf16.mxu1 %v1552_v13 }
  0x1e   :  { %1401 = vmatpush3.bf16.msra.mxu0 %v1606_v17 }
  0x1f   :  { %1408 = vmatprep.subr.bf16.mxu0 %v1552_v13 }
  0x21   :  { %1294 = vmatmul.mubr.msk.f32.vlgmr.msra.gmra.mrb[2].mxu0 %vm132_vm1, %v214_v18 }
  0x22   :  { %1410 = vmatpush3.bf16.msra.mxu0 %v1601_v10  ;;  %1315 = vmatprep.mubr.msk.f32.mxu0 %vm1553_vm2, %v1554_v19 }
  0x23   :  { %1411 = vmatprep.subr.bf16.mxu0 %v1552_v13 }
  0x26   :  { %1413 = vmatpush3.bf16.msra.mxu0 %v1606_v17 }
  0x27   :  { %1420 = vmatprep.subr.bf16.mxu0 %v1552_v13 }
  0xec   :  { %v1273_v21 = vpop.f32.mrb[0].mxu0 }
  0xed   :  { %v127_v22 = vadd.f32 %v1273_v21, %v1623_v20  ;;  %v121_v23 = vpop.f32.mrb[1].mxu0 }
  0xee   :  { %v122_v24 = vadd.f32 %v121_v23, %v1623_v20 }
  0xef   :  { %v131_v26 = vmax.f32 %v127_v22, 0.0 }
  0xf0   :  { %v130_v25 = vmax.f32 %v122_v24, 0.0 }
  0xf2   :  { %1282 = vmatprep.mubr.msk.f32.mxu1 %vm132_vm1, %v130_v25 }
  0xf3   :  { %1283 = vmatmul.mubr.msk.f32.vlgmr.msra.gmra.mrb[0].mxu1 %vm132_vm1, %v131_v26 }
  0xf4   :  { %1404 = vmatpush3.bf16.msra.mxu1 %v1601_v10  ;;  %1304 = vmatprep.mubr.msk.f32.mxu1 %vm1553_vm2, %v1554_v19  ;;  %v285_v27 = vpop.f32.mrb[2].mxu0 }
  0xf5   :  { %1405 = vmatprep.subr.bf16.mxu1 %v1552_v13  ;;  %v1295_v28 = vpop.f32.mrb[3].mxu0 }
  0xf8   :  { %1407 = vmatpush3.bf16.msra.mxu1 %v1606_v17 }
  0xf9   :  { %1414 = vmatprep.subr.bf16.mxu1 %v1552_v13 }
 0x1c6   :  { %v1284_v30 = vpop.f32.mrb[0].mxu1 }
 0x1c7   :  { %v1635_v31 = vadd.f32 %v1284_v30, %v44_v29  ;;  %v205_v32 = vpop.f32.mrb[1].mxu1 }
 0x1c8   :  { %v1637_v33 = vadd.f32 %v205_v32, %v44_v29 }
 0x1ca   :  { %v289_v34 = vadd.f32 %v285_v27, %v1637_v33 }
 0x1cc   :  { %1461 = vtanh.f32 %v289_v34  ;;  %v1194_v37 = vmul.f32 -1.442695, %v289_v34 }
 0x1ce   :  { %1463 = vpow2.f32 %v1194_v37 }
 0x1d6   :  { %v1462_v35 = vpop.eup %1461 }
 0x1d7   :  { %303 = vrot.lane.b32.xlu0 %v1462_v35, %s1555_s7 }
 0x1d8   :  { %v1464_v38 = vpop.eup %1463 }
 0x1d9   :  { %v293_v39 = vadd.f32 1.0, %v1464_v38 }
 0x1db   :  { %298 = vrot.lane.b32.xlu0 %v215_v36, %s1556_s10  ;;  %1465 = vrcp.f32 %v293_v39 }
 0x1e5   :  { %v1466_v40 = vpop.eup %1465 }
 0x249   :  { %v304_v41 = vpop.permute.xlu0 %303 }
 0x24a   :  { %v306_v42 = vmul.f32 %v1466_v40, %v304_v41 }
 0x24c   :  { %308 = vrot.lane.b32.xlu1 %v306_v42, %s1556_s10 }
 0x24d   :  { %v299_v43 = vpop.permute.xlu0 %298 }
 0x24e   :  { %v301_v44 = vmul.f32 %v1466_v40, %v299_v43 }
 0x2be   :  { %v309_v45 = vpop.permute.xlu1 %308 }
 0x2bf   :  { %v311_v46 = vadd.f32 %v309_v45, %v301_v44 }
 0x2c1   :  { %1467 = vtanh.f32 %v311_v46  ;;  %v405_v62 = vrot.slane %v311_v46, 6 }
 0x2cb   :  { %v1468_v47 = vpop.eup %1467 }
 0x2cc   :  { %314 = vrot.lane.b32.xlu1 %v1468_v47, %s1555_s7 }
 0x33e   :  { %v315_v48 = vpop.permute.xlu1 %314 }
 0x33f   :  { %v1647_v49 = vmul.f32 %v1466_v40, %v315_v48 }
 0x341   :  { %319 = vrot.lane.b32.xlu0 %v1647_v49, %s1556_s10 }
 0x3b3   :  { %v320_v50 = vpop.permute.xlu0 %319 }
 0x3b4   :  { %1305 = vmatmul.mubr.msk.f32.vlgmr.msra.gmra.mrb[2].mxu1 %vm132_vm1, %v320_v50 }
 0x3b5   :  { %1416 = vmatpush3.bf16.msra.mxu1 %v1601_v10  ;;  %1326 = vmatprep.mubr.msk.f32.mxu1 %vm1553_vm2, %v1554_v19 }
 0x3b6   :  { %1417 = vmatprep.subr.bf16.mxu1 %v1552_v13 }
 0x3b9   :  { %1419 = vmatpush3.bf16.msra.mxu1 %v1606_v17 }
 0x3ba   :  { %1426 = vmatprep.subr.bf16.mxu1 %v1552_v13 }
 0x487   :  { %v389_v51 = vpop.f32.mrb[2].mxu1 }
 0x488   :  { %v394_v52 = vrot.slane %v389_v51, 6  ;;  %v1306_v53 = vpop.f32.mrb[3].mxu1 }
 0x48a   :  { %v396_v54 = vadd.f32 %v394_v52, %v1637_v33 }
 0x48c   :  { %1469 = vtanh.f32 %v396_v54  ;;  %v1196_v56 = vmul.f32 -1.442695, %v396_v54 }
 0x48e   :  { %1471 = vpow2.f32 %v1196_v56 }
 0x496   :  { %v1470_v55 = vpop.eup %1469 }
 0x497   :  { %409 = vrot.lane.b32.xlu1 %v1470_v55, %s1555_s7 }
 0x498   :  { %v1472_v57 = vpop.eup %1471 }
 0x499   :  { %v400_v58 = vadd.f32 1.0, %v1472_v57 }
 0x49b   :  { %1473 = vrcp.f32 %v400_v58 }
 0x4a5   :  { %v1474_v59 = vpop.eup %1473 }
 0x4a6   :  { %v407_v63 = vmul.f32 %v1474_v59, %v405_v62 }
 0x509   :  { %v410_v60 = vpop.permute.xlu1 %409 }
 0x50a   :  { %v412_v61 = vmul.f32 %v1474_v59, %v410_v60 }
 0x50c   :  { %414 = vrot.lane.b32.xlu0 %v412_v61, %s1556_s10 }
 0x57e   :  { %v415_v0 = vpop.permute.xlu0 %414 }
 0x57f   :  { %v417_v1 = vadd.f32 %v415_v0, %v407_v63 }
 0x581   :  { %1475 = vtanh.f32 %v417_v1  ;;  %v512_v23 = vrot.slane %v417_v1, 6 }
 0x58b   :  { %v1476_v2 = vpop.eup %1475 }
 0x58c   :  { %420 = vrot.lane.b32.xlu1 %v1476_v2, %s1555_s7 }
 0x5fe   :  { %v421_v3 = vpop.permute.xlu1 %420 }
 0x5ff   :  { %v423_v4 = vmul.f32 %v1474_v59, %v421_v3 }
 0x601   :  { %v425_v5 = vrot.slane %v423_v4, 2  ;;  %v1063_v30 = vsel %vm1062_vm3, %v1647_v49, %v423_v4 }
 0x603   :  { %426 = vrot.lane.b32.xlu0 %v425_v5, %s1556_s10 }
 0x675   :  { %v427_v6 = vpop.permute.xlu0 %426 }
 0x676   :  { %1316 = vmatmul.mubr.msk.f32.vlgmr.msra.gmra.mrb[4].mxu0 %vm132_vm1, %v427_v6 }
 0x677   :  { %1422 = vmatpush3.bf16.msra.mxu0 %v1601_v10  ;;  %1337 = vmatprep.mubr.msk.f32.mxu0 %vm1553_vm2, %v1554_v19 }
 0x678   :  { %1423 = vmatprep.subr.bf16.mxu0 %v1552_v13 }
 0x67b   :  { %1425 = vmatpush3.bf16.msra.mxu0 %v1606_v17 }
 0x67c   :  { %1432 = vmatprep.subr.bf16.mxu0 %v1552_v13 }
 0x749   :  { %v496_v7 = vpop.f32.mrb[4].mxu0 }
 0x74a   :  { %v501_v8 = vrot.slane %v496_v7, 4  ;;  %v1317_v9 = vpop.f32.mrb[5].mxu0 }
 0x74c   :  { %v503_v11 = vadd.f32 %v501_v8, %v1637_v33 }
 0x74e   :  { %1477 = vtanh.f32 %v503_v11  ;;  %v1198_v14 = vmul.f32 -1.442695, %v503_v11 }
 0x750   :  { %1479 = vpow2.f32 %v1198_v14 }
 0x758   :  { %v1478_v12 = vpop.eup %1477 }
 0x759   :  { %516 = vrot.lane.b32.xlu1 %v1478_v12, %s1555_s7 }
 0x75a   :  { %v1480_v15 = vpop.eup %1479 }
 0x75b   :  { %v507_v16 = vadd.f32 1.0, %v1480_v15 }
 0x75d   :  { %1481 = vrcp.f32 %v507_v16 }
 0x767   :  { %v1482_v18 = vpop.eup %1481 }
 0x768   :  { %v514_v24 = vmul.f32 %v1482_v18, %v512_v23 }
 0x7cb   :  { %v517_v21 = vpop.permute.xlu1 %516 }
 0x7cc   :  { %v519_v22 = vmul.f32 %v1482_v18, %v517_v21 }
 0x7ce   :  { %521 = vrot.lane.b32.xlu0 %v519_v22, %s1556_s10 }
 0x840   :  { %v522_v25 = vpop.permute.xlu0 %521 }
 0x841   :  { %v524_v26 = vadd.f32 %v522_v25, %v514_v24 }
 0x843   :  { %1483 = vtanh.f32 %v524_v26  ;;  %v619_v47 = vrot.slane %v524_v26, 6 }
 0x84d   :  { %v1484_v27 = vpop.eup %1483 }
 0x84e   :  { %527 = vrot.lane.b32.xlu1 %v1484_v27, %s1555_s7 }
 0x8c0   :  { %v528_v28 = vpop.permute.xlu1 %527 }
 0x8c1   :  { %v530_v29 = vmul.f32 %v1482_v18, %v528_v28 }
 0x8c3   :  { %v532_v32 = vrot.slane %v530_v29, 4  ;;  %v1065_v34 = vsel %vm1064_vm4, %v1063_v30, %v530_v29 }
 0x8c5   :  { %533 = vrot.lane.b32.xlu0 %v532_v32, %s1556_s10 }
 0x937   :  { %v534_v35 = vpop.permute.xlu0 %533 }
 0x938   :  { %1327 = vmatmul.mubr.msk.f32.vlgmr.msra.gmra.mrb[4].mxu1 %vm132_vm1, %v534_v35 }
 0x939   :  { %1428 = vmatpush3.bf16.msra.mxu1 %v1601_v10  ;;  %1348 = vmatprep.mubr.msk.f32.mxu1 %vm1553_vm2, %v1554_v19 }
 0x93a   :  { %1429 = vmatprep.subr.bf16.mxu1 %v1552_v13 }
 0x93d   :  { %1431 = vmatpush3.bf16.msra.mxu1 %v1606_v17 }
 0x93e   :  { %1438 = vmatprep.subr.bf16.mxu1 %v1552_v13 }
 0xa0b   :  { %v603_v36 = vpop.f32.mrb[4].mxu1 }
 0xa0c   :  { %v608_v37 = vrot.slane %v603_v36, 2  ;;  %v1328_v38 = vpop.f32.mrb[5].mxu1 }
 0xa0e   :  { %v610_v39 = vadd.f32 %v608_v37, %v1637_v33 }
 0xa10   :  { %1485 = vtanh.f32 %v610_v39  ;;  %v1200_v41 = vmul.f32 -1.442695, %v610_v39 }
 0xa12   :  { %1487 = vpow2.f32 %v1200_v41 }
 0xa1a   :  { %v1486_v40 = vpop.eup %1485 }
 0xa1b   :  { %623 = vrot.lane.b32.xlu1 %v1486_v40, %s1555_s7 }
 0xa1c   :  { %v1488_v42 = vpop.eup %1487 }
 0xa1d   :  { %v614_v43 = vadd.f32 1.0, %v1488_v42 }
 0xa1f   :  { %1489 = vrcp.f32 %v614_v43 }
 0xa29   :  { %v1490_v44 = vpop.eup %1489 }
 0xa2a   :  { %v621_v48 = vmul.f32 %v1490_v44, %v619_v47 }
 0xa8d   :  { %v624_v45 = vpop.permute.xlu1 %623 }
 0xa8e   :  { %v626_v46 = vmul.f32 %v1490_v44, %v624_v45 }
 0xa90   :  { %628 = vrot.lane.b32.xlu0 %v626_v46, %s1556_s10 }
 0xb02   :  { %v629_v49 = vpop.permute.xlu0 %628 }
 0xb03   :  { %v631_v50 = vadd.f32 %v629_v49, %v621_v48 }
 0xb05   :  { %1491 = vtanh.f32 %v631_v50  ;;  %v723_v2 = vrot.slane %v631_v50, 6 }
 0xb0f   :  { %v1492_v33 = vpop.eup %1491 }
 0xb10   :  { %634 = vrot.lane.b32.xlu1 %v1492_v33, %s1555_s7 }
 0xb82   :  { %v635_v51 = vpop.permute.xlu1 %634 }
 0xb83   :  { %v637_v52 = vmul.f32 %v1490_v44, %v635_v51 }
 0xb85   :  { %v639_v53 = vrot.slane %v637_v52, 6  ;;  %v1690_v54 = vsel %vm1066_vm5, %v1065_v34, %v637_v52 }
 0xb87   :  { %640 = vrot.lane.b32.xlu0 %v639_v53, %s1556_s10 }
 0xbf9   :  { %v641_v55 = vpop.permute.xlu0 %640 }
 0xbfa   :  { %1338 = vmatmul.mubr.msk.f32.vlgmr.msra.gmra.mrb[6].mxu0 %vm132_vm1, %v641_v55 }
 0xbfb   :  { %1434 = vmatpush3.bf16.msra.mxu0 %v1601_v10  ;;  %1359 = vmatprep.mubr.msk.f32.mxu0 %vm1553_vm2, %v1554_v19 }
 0xbfc   :  { %1435 = vmatprep.subr.bf16.mxu0 %v1552_v13 }
 0xbff   :  { %1437 = vmatpush3.bf16.msra.mxu0 %v1606_v17 }
 0xccd   :  { %v710_v56 = vpop.f32.mrb[6].mxu0 }
 0xcce   :  { %v714_v57 = vadd.f32 %v710_v56, %v1635_v31  ;;  %v1339_v58 = vpop.f32.mrb[7].mxu0 }
 0xcd0   :  { %1493 = vtanh.f32 %v714_v57  ;;  %v1202_v60 = vmul.f32 -1.442695, %v714_v57 }
 0xcd2   :  { %1495 = vpow2.f32 %v1202_v60 }
 0xcda   :  { %v1494_v59 = vpop.eup %1493 }
 0xcdb   :  { %727 = vrot.lane.b32.xlu1 %v1494_v59, %s1555_s7 }
 0xcdc   :  { %v1496_v61 = vpop.eup %1495 }
 0xcdd   :  { %v718_v62 = vadd.f32 1.0, %v1496_v61 }
 0xcdf   :  { %1497 = vrcp.f32 %v718_v62 }
 0xce9   :  { %v1498_v63 = vpop.eup %1497 }
 0xcea   :  { %v725_v3 = vmul.f32 %v1498_v63, %v723_v2 }
 0xd4d   :  { %v728_v0 = vpop.permute.xlu1 %727 }
 0xd4e   :  { %v730_v1 = vmul.f32 %v1498_v63, %v728_v0 }
 0xd50   :  { %732 = vrot.lane.b32.xlu0 %v730_v1, %s1556_s10 }
 0xdc2   :  { %v733_v4 = vpop.permute.xlu0 %732 }
 0xdc3   :  { %v735_v5 = vadd.f32 %v733_v4, %v725_v3 }
 0xdc5   :  { %1499 = vtanh.f32 %v735_v5 }
 0xdcf   :  { %v1500_v6 = vpop.eup %1499 }
 0xdd0   :  { %738 = vrot.lane.b32.xlu1 %v1500_v6, %s1555_s7 }
 0xe42   :  { %v739_v7 = vpop.permute.xlu1 %738 }
 0xe43   :  { %v1703_v8 = vmul.f32 %v1498_v63, %v739_v7  ;;  %v40_v7 = vld [vmem:[#allocation2 + $0x60] sm:$0xff] }
 0xe45   :  { %743 = vrot.lane.b32.xlu0 %v1703_v8, %s1556_s10 }
 0xeb7   :  { %v744_v9 = vpop.permute.xlu0 %743 }
 0xeb8   :  { %1349 = vmatmul.mubr.msk.f32.vlgmr.msra.gmra.mrb[6].mxu1 %vm132_vm1, %v744_v9  ;;  %v42_v9 = vld [vmem:[#allocation2 + $0x80] sm:$0xff] }
 0xeb9   :  { %1440 = vmatpush3.bf16.msra.mxu1 %v1601_v10  ;;  %1370 = vmatprep.mubr.msk.f32.mxu1 %vm1553_vm2, %v1554_v19 }
 0xeba   :  { %1441 = vmatprep.subr.bf16.mxu1 %v1552_v13  ;;  %v829_v13 = vrot.slane %v735_v5, 6 }
 0xebd   :  { %1443 = vmatpush3.bf16.msra.mxu1 %v1606_v17 }
 0xf8b   :  { %v813_v11 = vpop.f32.mrb[6].mxu1 }
 0xf8c   :  { %v818_v12 = vrot.slane %v813_v11, 6  ;;  %v1350_v14 = vpop.f32.mrb[7].mxu1 }
 0xf8e   :  { %v820_v15 = vadd.f32 %v818_v12, %v1635_v31  ;;  %v43_v12 = vld [vmem:[#allocation2 + $0x90] sm:$0xff] }
 0xf8f   :  { %v1448_v14 = vpack.c.bf16 %v43_v12, %v42_v9 }
 0xf90   :  { %1501 = vtanh.f32 %v820_v15  ;;  %v1204_v18 = vmul.f32 -1.442695, %v820_v15 }
 0xf92   :  { %1503 = vpow2.f32 %v1204_v18 }
 0xf9a   :  { %v1502_v16 = vpop.eup %1501 }
 0xf9b   :  { %833 = vrot.lane.b32.xlu1 %v1502_v16, %s1555_s7 }
 0xf9c   :  { %v1504_v21 = vpop.eup %1503 }
 0xf9d   :  { %v824_v10 = vadd.f32 1.0, %v1504_v21 }
 0xf9f   :  { %1505 = vrcp.f32 %v824_v10 }
 0xfa9   :  { %v1506_v22 = vpop.eup %1505 }
 0xfaa   :  { %v831_v17 = vmul.f32 %v1506_v22, %v829_v13 }
0x100d   :  { %v834_v19 = vpop.permute.xlu1 %833 }
0x100e   :  { %v836_v23 = vmul.f32 %v1506_v22, %v834_v19 }
0x1010   :  { %838 = vrot.lane.b32.xlu0 %v836_v23, %s1556_s10 }
0x1082   :  { %v839_v24 = vpop.permute.xlu0 %838 }
0x1083   :  { %v841_v25 = vadd.f32 %v839_v24, %v831_v17 }
0x1085   :  { %1507 = vtanh.f32 %v841_v25  ;;  %v936_v44 = vrot.slane %v841_v25, 6 }
0x108f   :  { %v1508_v26 = vpop.eup %1507 }
0x1090   :  { %844 = vrot.lane.b32.xlu1 %v1508_v26, %s1555_s7 }
0x1102   :  { %v845_v27 = vpop.permute.xlu1 %844 }
0x1103   :  { %v847_v28 = vmul.f32 %v1506_v22, %v845_v27 }
0x1105   :  { %v849_v29 = vrot.slane %v847_v28, 2  ;;  %v1068_v33 = vsel %vm1062_vm3, %v1703_v8, %v847_v28  ;;  %v41_v8 = vld [vmem:[#allocation2 + $0x70] sm:$0xff] }
0x1106   :  { %v1444_v11 = vpack.c.bf16 %v41_v8, %v40_v7 }
0x1107   :  { %850 = vrot.lane.b32.xlu0 %v849_v29, %s1556_s10 }
0x1108   :  { %1445 = vmatprep.subr.bf16.mxu0 %v1444_v11 }
0x1179   :  { %v851_v30 = vpop.permute.xlu0 %850 }
0x117a   :  { %1360 = vmatmul.mubr.msk.f32.vlgmr.msra.gmra.mrb[8].mxu0 %vm132_vm1, %v851_v30 }
0x117b   :  { %1447 = vmatpush3.bf16.msra.mxu0 %v1444_v11 }
0x117c   :  { %1449 = vmatprep.subr.bf16.mxu0 %v1448_v14 }
0x117f   :  { %1451 = vmatpush3.bf16.msra.mxu0 %v1448_v14 }
0x124d   :  { %v920_v32 = vpop.f32.mrb[8].mxu0 }
0x124e   :  { %v925_v34 = vrot.slane %v920_v32, 4  ;;  %v1361_v35 = vpop.f32.mrb[9].mxu0 }
0x1250   :  { %v927_v36 = vadd.f32 %v925_v34, %v1635_v31 }
0x1252   :  { %1509 = vtanh.f32 %v927_v36  ;;  %v1206_v38 = vmul.f32 -1.442695, %v927_v36 }
0x1254   :  { %1511 = vpow2.f32 %v1206_v38 }
0x125c   :  { %v1510_v37 = vpop.eup %1509 }
0x125d   :  { %940 = vrot.lane.b32.xlu1 %v1510_v37, %s1555_s7 }
0x125e   :  { %v1512_v39 = vpop.eup %1511 }
0x125f   :  { %v931_v40 = vadd.f32 1.0, %v1512_v39 }
0x1261   :  { %1513 = vrcp.f32 %v931_v40 }
0x126b   :  { %v1514_v41 = vpop.eup %1513 }
0x126c   :  { %v938_v45 = vmul.f32 %v1514_v41, %v936_v44 }
0x12cf   :  { %v941_v42 = vpop.permute.xlu1 %940 }
0x12d0   :  { %v943_v43 = vmul.f32 %v1514_v41, %v941_v42 }
0x12d2   :  { %945 = vrot.lane.b32.xlu0 %v943_v43, %s1556_s10 }
0x1344   :  { %v946_v46 = vpop.permute.xlu0 %945 }
0x1345   :  { %v948_v47 = vadd.f32 %v946_v46, %v938_v45 }
0x1347   :  { %1515 = vtanh.f32 %v948_v47  ;;  %v1043_v2 = vrot.slane %v948_v47, 6 }
0x1351   :  { %v1516_v48 = vpop.eup %1515 }
0x1352   :  { %951 = vrot.lane.b32.xlu1 %v1516_v48, %s1555_s7 }
0x13c4   :  { %v952_v49 = vpop.permute.xlu1 %951 }
0x13c5   :  { %v954_v50 = vmul.f32 %v1514_v41, %v952_v49 }
0x13c7   :  { %v956_v51 = vrot.slane %v954_v50, 4  ;;  %v1069_v52 = vsel %vm1064_vm4, %v1068_v33, %v954_v50 }
0x13c9   :  { %957 = vrot.lane.b32.xlu0 %v956_v51, %s1556_s10 }
0x143b   :  { %v958_v53 = vpop.permute.xlu0 %957 }
0x143c   :  { %1371 = vmatmul.mubr.msk.f32.vlgmr.msra.gmra.mrb[8].mxu1 %vm132_vm1, %v958_v53 }
0x150f   :  { %v1027_v55 = vpop.f32.mrb[8].mxu1 }
0x1510   :  { %v1032_v56 = vrot.slane %v1027_v55, 2  ;;  %v1372_v57 = vpop.f32.mrb[9].mxu1 }
0x1512   :  { %v1034_v58 = vadd.f32 %v1032_v56, %v1635_v31 }
0x1514   :  { %1517 = vtanh.f32 %v1034_v58  ;;  %v1208_v60 = vmul.f32 -1.442695, %v1034_v58 }
0x1516   :  { %1519 = vpow2.f32 %v1208_v60 }
0x151e   :  { %v1518_v59 = vpop.eup %1517 }
0x151f   :  { %1047 = vrot.lane.b32.xlu1 %v1518_v59, %s1555_s7 }
0x1520   :  { %v1520_v61 = vpop.eup %1519 }
0x1521   :  { %v1038_v62 = vadd.f32 1.0, %v1520_v61 }
0x1523   :  { %1521 = vrcp.f32 %v1038_v62 }
0x152d   :  { %v1522_v63 = vpop.eup %1521 }
0x152e   :  { %v1045_v3 = vmul.f32 %v1522_v63, %v1043_v2 }
0x1591   :  { %v1048_v0 = vpop.permute.xlu1 %1047 }
0x1592   :  { %v1050_v1 = vmul.f32 %v1522_v63, %v1048_v0 }
0x1594   :  { %1052 = vrot.lane.b32.xlu0 %v1050_v1, %s1556_s10 }
0x1598   :  { %1073 = vrot.lane.b32.xlu0 %v1690_v54, %s1556_s10 }
0x1606   :  { %v1053_v31 = vpop.permute.xlu0 %1052 }
0x1607   :  { %v1055_v4 = vadd.f32 %v1053_v31, %v1045_v3 }
0x1609   :  { %1523 = vtanh.f32 %v1055_v4  ;;  %v1169_v5 = vrot.slane %v1055_v4, 4 }
0x160a   :  { %v1074_v6 = vpop.permute.xlu0 %1073 }
0x160b   :  { %1381 = vmatprep.mubr.msk.f32.mxu0 %vm132_vm1, %v1074_v6  ;;  %1170 = vrot.lane.b32.xlu0 %v1169_v5, %s1555_s7 }
0x1613   :  { %v1524_v54 = vpop.eup %1523 }
0x1614   :  { %1058 = vrot.lane.b32.xlu1 %v1524_v54, %s1555_s7 }
0x167d   :  { %v1171_v10 = vpop.permute.xlu0 %1170 }
0x1686   :  { %v1059_v15 = vpop.permute.xlu1 %1058 }
0x1687   :  { %v1061_v16 = vmul.f32 %v1522_v63, %v1059_v15 }
0x1689   :  { %v1166_v18 = vrot.slane %v1061_v16, 6  ;;  %v1070_v21 = vsel %vm1066_vm5, %v1069_v52, %v1061_v16 }
0x168a   :  { %1075 = vrot.lane.b32.xlu1 %v1070_v21, %s1556_s10 }
0x168b   :  { %v1173_v22 = vsel %vm1062_vm3, %v1166_v18, %v1171_v10 }
0x168c   :  { %1175 = vrot.lane.b32.xlu0 %v1173_v22, %s1556_s10 }
0x168e   :  { %1078 = vrot.lane.b32.xlu1 %v1623_v20, %s1557_s1 }
0x16fc   :  { %v1076_v19 = vpop.permute.xlu1 %1075 }
0x16fd   :  { %1382 = vmatmul.mubr.msk.f32.vlgmr.msra.gmra.mrb[10].mxu0 %vm132_vm1, %v1076_v19 }
0x16fe   :  { %v1176_v23 = vpop.permute.xlu0 %1175 }
0x16ff   :  { %1179 = vst.msk [vmem:[%s1755_s4] sm:$0xf] %vm1178_vm6, %v1176_v23 }
0x1700   :  { %v1079_v13 = vpop.permute.xlu1 %1078 }
0x17d0   :  { %v1383_v17 = vpop.f32.mrb[10].mxu0 }
0x17d1   :  { %v1157_v24 = vadd.f32 %v1383_v17, %v1079_v13  ;;  %v1151_v25 = vpop.f32.mrb[11].mxu0 }
0x17d2   :  { %v1152_v26 = vadd.f32 %v1151_v25, %v1079_v13 }
0x17d3   :  { %v1161_v27 = vmax.f32 %v1157_v24, 0.0 }
0x17d4   :  { %v1160_v28 = vmax.f32 %v1152_v26, 0.0 }
0x17d5   :  { %1164 = vst.msk [vmem:[%s1754_s3 + $0x8] sm:$0xff] %vm1162_vm7, %v1161_v27 }
0x17d6   :  { %1163 = vst.msk [vmem:[%s1754_s3] sm:$0xff] %vm1162_vm7, %v1160_v28 }
0x17d7   :  { %1188 = vsyncpa [#allocation3], 1 }

</bundles_post_ra>
